<compile_context>
chip_gen: v5e
topology: v5e:2x2
jax: 0.10.0
libtpu: 0.0.40
codegen_flags: <defaults>
</compile_context>

<pallas_src>
import functools

import jax
import jax.numpy as jnp
from jax.experimental import pallas as pl
from jax.experimental.pallas import tpu as pltpu


def _accuracy_kernel(scores_ref, labels_ref, out_ref, *, n_total):
    i = pl.program_id(0)

    scores = scores_ref[...]            # [C, tile_n], native dtype (f32 / bf16)
    labels = labels_ref[...]            # [1, tile_n] int32
    c, tile_n = scores.shape

    # argmax over the class (sublane) axis, first maximal index on ties.
    max_val = jnp.max(scores, axis=0, keepdims=True)               # [1, tile_n]
    is_max = scores == max_val                                      # [C, tile_n]
    row_ids = jax.lax.broadcasted_iota(jnp.int32, (c, tile_n), 0)
    pred = jnp.min(jnp.where(is_max, row_ids, jnp.int32(c)),
                   axis=0, keepdims=True)                           # [1, tile_n]

    # In-kernel ragged masking: only columns whose *global* index is < n_total
    # contribute.  The out-of-bounds part of the last block holds unspecified
    # scores/labels, so the mask gates the compare result itself.
    col = jax.lax.broadcasted_iota(jnp.int32, (1, tile_n), 1) + i * tile_n
    valid = col < n_total
    correct = jnp.where(valid & (pred == labels), jnp.int32(1), jnp.int32(0))
    count = jnp.sum(correct)                                        # scalar int32

    # Per-tile partial count -> lane 0 of this tile's (1, 128) output block.
    lane0 = jax.lax.broadcasted_iota(jnp.int32, out_ref.shape, 1) == 0
    out_ref[...] = jnp.where(lane0, count, jnp.int32(0))


def accuracy_from_class_major(scores_cn, y_true, *, max_tile_n=65536,
                              vmem_budget_bytes=24 * 1024 * 1024):
    """Accuracy from class-major scores.

    :param scores_cn: [C, N] scores/logits (f32 or bf16, kept in native dtype)
    :param y_true:    [N] integer class labels
    :return: scalar float32 accuracy
    """
    scores_cn = jnp.asarray(scores_cn)
    y_true = jnp.asarray(y_true)
    c, n = scores_cn.shape
    labels = y_true.astype(jnp.int32).reshape(1, n)

    # Tile selection: multiple of 128, as large as possible within the VMEM
    # budget (double-buffered scores + labels).
    itemsize = jnp.dtype(scores_cn.dtype).itemsize
    c_pad = ((c + 7) // 8) * 8
    bytes_per_col = 2 * (c_pad * itemsize + 8 * 4)
    budget_cols = max(128, (vmem_budget_bytes // bytes_per_col) // 128 * 128)
    tile_n = min(max_tile_n, pl.cdiv(n, 128) * 128, budget_cols)
    tile_n = max(128, (tile_n // 128) * 128)
    num_tiles = pl.cdiv(n, tile_n)

    partials = pl.pallas_call(
        functools.partial(_accuracy_kernel, n_total=n),
        out_shape=jax.ShapeDtypeStruct((1, num_tiles * 128), jnp.int32),
        grid=(num_tiles,),
        in_specs=[
            pl.BlockSpec((c, tile_n), lambda i: (0, i)),
            pl.BlockSpec((1, tile_n), lambda i: (0, i)),
        ],
        out_specs=pl.BlockSpec((1, 128), lambda i: (0, i)),
        compiler_params=pltpu.CompilerParams(
            dimension_semantics=("parallel",),
            vmem_limit_bytes=32 * 1024 * 1024),
    )(scores_cn, labels)

    total = jnp.sum(partials)                       # only lane 0 of each block is non-zero
    return total.astype(jnp.float32) / jnp.float32(n)


def accuracy(y_score, y_true, *, max_tile_n=65536):
    """Pallas equivalent of Accuracy.forward (torch [N, C] / [N] signature).

    Performs one transpose copy to the lane-dense [C, N] layout; callers that
    can produce class-major scores should use accuracy_from_class_major().
    """
    y_score = jnp.asarray(y_score)
    return accuracy_from_class_major(y_score.T, y_true, max_tile_n=max_tile_n)


def _reference(y_score, y_true):
    pred = jnp.argmax(jnp.asarray(y_score), axis=1).astype(jnp.int32)
    return jnp.mean((pred == jnp.asarray(y_true, jnp.int32)).astype(jnp.float32))


if __name__ == "__main__":
    key = jax.random.PRNGKey(0)
    k1, k2, k3, k4 = jax.random.split(key, 4)

    # Small demo matching the module's [N, C] scores / [N] labels signature.
    N, C = 8, 10
    y_score = jax.random.normal(k1, (N, C), dtype=jnp.float32)
    y_true = jax.random.randint(k2, (N,), 0, C, dtype=jnp.int32)
    acc = accuracy(y_score, y_true)
    jax.block_until_ready(acc)
    assert jnp.allclose(acc, _reference(y_score, y_true)), acc

    # Multi-tile + ragged-tail path (forces several grid steps + in-kernel mask).
    N2, C2 = 2500, 10
    y_score2 = jax.random.normal(k3, (N2, C2), dtype=jnp.float32)
    y_true2 = jax.random.randint(k4, (N2,), 0, C2, dtype=jnp.int32)
    acc2 = accuracy(y_score2, y_true2, max_tile_n=512)
    jax.block_until_ready(acc2)
    assert jnp.allclose(acc2, _reference(y_score2, y_true2)), acc2

    # bf16 fast path through the class-major entry point (no transpose pass
    # inside accuracy_from_class_major; half the HBM traffic).
    acc3 = accuracy_from_class_major(y_score2.T.astype(jnp.bfloat16), y_true2,
                                     max_tile_n=1024)
    jax.block_until_ready(acc3)
    assert jnp.allclose(acc3, _reference(y_score2.astype(jnp.bfloat16), y_true2)), acc3

    print("KERNEL_OK")
</pallas_src>

<mosaic_0001>
module attributes {stable_mosaic.version = 11 : i64} {
  func.func @_accuracy_kernel(%arg0: i32, %arg1: memref<10x128xf32, #tpu.memory_space<vmem>>, %arg2: memref<1x128xi32, #tpu.memory_space<vmem>>, %arg3: memref<1x128xi32, #tpu.memory_space<vmem>>) attributes {dimension_semantics = [#tpu.dimension_semantics<parallel>], iteration_bounds = array<i64: 1>, scalar_prefetch = 0 : i64, scratch_operands = 0 : i64, tpu.core_type = #tpu.core_type<tc>, window_params = [{transform_indices = @transform_0, window_bounds = array<i64: 10, 128>}, {transform_indices = @transform_1, window_bounds = array<i64: 1, 128>}, {transform_indices = @transform_2, window_bounds = array<i64: 1, 128>}]} {
    %c0 = arith.constant 0 : index
    %c0_0 = arith.constant 0 : index
    %0 = vector.load %arg1[%c0, %c0_0] : memref<10x128xf32, #tpu.memory_space<vmem>>, vector<10x128xf32>
    %c0_1 = arith.constant 0 : index
    %c0_2 = arith.constant 0 : index
    %1 = vector.load %arg2[%c0_1, %c0_2] : memref<1x128xi32, #tpu.memory_space<vmem>>, vector<1x128xi32>
    %cst = arith.constant dense<0xFF800000> : vector<128xf32>
    %2 = vector.multi_reduction <maximumf>, %0, %cst [0] : vector<10x128xf32> to vector<128xf32>
    %3 = vector.shape_cast %2 : vector<128xf32> to vector<1x128xf32>
    %4 = vector.broadcast %3 : vector<1x128xf32> to vector<10x128xf32>
    %5 = arith.cmpf oeq, %0, %4 : vector<10x128xf32>
    %6 = tpu.iota {dimensions = array<i32: 0>} : vector<10x128xi32>
    %c10_i32 = arith.constant 10 : i32
    %7 = vector.broadcast %c10_i32 : i32 to vector<10x128xi32>
    %8 = arith.select %5, %6, %7 : vector<10x128xi1>, vector<10x128xi32>
    %cst_3 = arith.constant dense<2147483647> : vector<128xi32>
    %9 = vector.multi_reduction <minsi>, %8, %cst_3 [0] : vector<10x128xi32> to vector<128xi32>
    %10 = vector.shape_cast %9 : vector<128xi32> to vector<1x128xi32>
    %11 = tpu.iota {dimensions = array<i32: 1>} : vector<1x128xi32>
    %c128_i32 = arith.constant 128 : i32
    %12 = arith.muli %arg0, %c128_i32 : i32
    %13 = vector.broadcast %12 : i32 to vector<1x128xi32>
    %14 = arith.addi %11, %13 : vector<1x128xi32>
    %c8_i32 = arith.constant 8 : i32
    %15 = vector.broadcast %c8_i32 : i32 to vector<1x128xi32>
    %16 = arith.cmpi slt, %14, %15 : vector<1x128xi32>
    %17 = arith.cmpi eq, %10, %1 : vector<1x128xi32>
    %18 = arith.andi %16, %17 : vector<1x128xi1>
    %c1_i32 = arith.constant 1 : i32
    %c0_i32 = arith.constant 0 : i32
    %19 = vector.broadcast %c1_i32 : i32 to vector<1x128xi32>
    %20 = vector.broadcast %c0_i32 : i32 to vector<1x128xi32>
    %21 = arith.select %18, %19, %20 : vector<1x128xi1>, vector<1x128xi32>
    %22 = vector.shape_cast %21 : vector<1x128xi32> to vector<1x1x128xi32>
    %cst_4 = arith.constant dense<0> : vector<1xi32>
    %23 = vector.multi_reduction <add>, %22, %cst_4 [1, 2] : vector<1x1x128xi32> to vector<1xi32>
    %24 = vector.shape_cast %23 : vector<1xi32> to vector<1x1x1xi32>
    %25 = vector.extract %24[0, 0, 0] : i32 from vector<1x1x1xi32>
    %26 = tpu.iota {dimensions = array<i32: 1>} : vector<1x128xi32>
    %c0_i32_5 = arith.constant 0 : i32
    %27 = vector.broadcast %c0_i32_5 : i32 to vector<1x128xi32>
    %28 = arith.cmpi eq, %26, %27 : vector<1x128xi32>
    %c0_i32_6 = arith.constant 0 : i32
    %29 = vector.broadcast %25 : i32 to vector<1x128xi32>
    %30 = vector.broadcast %c0_i32_6 : i32 to vector<1x128xi32>
    %31 = arith.select %28, %29, %30 : vector<1x128xi1>, vector<1x128xi32>
    %c0_7 = arith.constant 0 : index
    %c0_8 = arith.constant 0 : index
    %32 = vector.load %arg3[%c0_7, %c0_8] : memref<1x128xi32, #tpu.memory_space<vmem>>, vector<1x128xi32>
    tpu.vector_store %arg3[%c0_7, %c0_8], %31 {strides = array<i32>} : memref<1x128xi32, #tpu.memory_space<vmem>>, vector<1x128xi32>,
    return
  }
  func.func @transform_0(%arg0: i32) -> (i32, i32) {
    %c0_i32 = arith.constant 0 : i32
    %c0_i32_0 = arith.constant 0 : i32
    return %c0_i32, %arg0 : i32, i32
  }
  func.func @transform_1(%arg0: i32) -> (i32, i32) {
    %c0_i32 = arith.constant 0 : i32
    %c0_i32_0 = arith.constant 0 : i32
    return %c0_i32, %arg0 : i32, i32
  }
  func.func @transform_2(%arg0: i32) -> (i32, i32) {
    %c0_i32 = arith.constant 0 : i32
    %c0_i32_0 = arith.constant 0 : i32
    return %c0_i32, %arg0 : i32, i32
  }
}

</mosaic_0001>

<bundles_post_ra>
// kernel: tpu_custom_call.1
= control target key start
LH: loop header
LB: loop body
LE: loop exit
PB: predicated region body
PF: predicated region fallthrough
CT: control target
= control target key end

     0   :  { %vm15_vm0 = vcmask 1041408   ;;  %s154_s0 = inlined_call_operand.vmem [shape: f32[10,8], index: 0, kind: input, shape index: {}]   ;;  %s155_s1 = inlined_call_operand.vmem [shape: s32[1,8], index: 1, kind: input, shape index: {}]   ;;  %s156_s2 = inlined_call_operand.hbm [shape: s32[1,128], index: 2, kind: output, shape index: {}]  }
   0x1   :  { %v12_v0 = vld [vmem:[%s154_s0] sm:$0xff]  ;;  %v13_v1 = vld [vmem:[%s154_s0 + $0x8] sm:$0x3] }
   0x2   :  { %v16_v2 = vsel %vm15_vm0, %v13_v1, -inf }
   0x3   :  { %7 = vsyncpa [#allocation3], 0  ;;  %v17_v3 = vmax.f32 %v12_v0, %v16_v2  ;;  %v26_v5 = vlaneseq  ;;  %v14_v23 = vld [vmem:[%s155_s1] sm:$0x1]  ;;  %vm52_vm9 = vcmask 1040384   ;;  %v123_v25 = vmov 0  }
   0x4   :  { %s124_s1 = smov [#allocation2]   ;;  %s84_s17 = sshll.u32 %s156_s2, 4  ;;  %s85_s17 = int_to_ptr.hbm [resolvable:$true] %s84_s17 }
   0x5   :  { %v18_v4 = vrot.slane %v17_v3, 4  ;;  %v27_v8 = vshrl.u32 %v26_v5, 7  ;;  %v44_v20 = vand.u32 127, %v26_v5  ;;  %s82_s14 = sshll.u32 %s124_s1, 4  ;;  %s83_s14 = int_to_ptr.vmem [resolvable:$true] %s82_s14 }
   0x7   :  { %v19_v6 = vmax.f32 %v17_v3, %v18_v4  ;;  %v28_v11 = vadd.s32 8, %v27_v8  ;;  %vm48_vm7 = vcmp.lt.s32.totalorder %v44_v20, 8  ;;  %vm73_vm11 = vcmp.eq.s32.totalorder %v44_v20, 0 }
   0x9   :  { %v20_v7 = vrot.slane %v19_v6, 2 }
   0xb   :  { %v21_v9 = vmax.f32 %v19_v6, %v20_v7 }
   0xd   :  { %v22_v10 = vrot.slane %v21_v9, 1 }
   0xf   :  { %v23_v12 = vmax.f32 %v21_v9, %v22_v10 }
  0x11   :  { %vm24_vm1 = vcmp.eq.f32.partialorder %v12_v0, %v23_v12  ;;  %vm25_vm2 = vcmp.eq.f32.partialorder %v13_v1, %v23_v12 }
  0x12   :  { %v29_v13 = vsel %vm24_vm1, %v27_v8, 10  ;;  %v30_v14 = vsel %vm25_vm2, %v28_v11, 10 }
  0x13   :  { %v31_v15 = vsel %vm15_vm0, %v30_v14, 2147483647 }
  0x14   :  { %vm32_vm3 = vcmp.lt.s32.totalorder %v29_v13, %v31_v15 }
  0x15   :  { %v33_v16 = vsel %vm32_vm3, %v29_v13, %v31_v15 }
  0x16   :  { %v34_v17 = vrot.slane %v33_v16, 4 }
  0x18   :  { %vm35_vm4 = vcmp.lt.s32.totalorder %v33_v16, %v34_v17 }
  0x19   :  { %v36_v18 = vsel %vm35_vm4, %v33_v16, %v34_v17 }
  0x1a   :  { %v37_v19 = vrot.slane %v36_v18, 2 }
  0x1c   :  { %vm38_vm5 = vcmp.lt.s32.totalorder %v36_v18, %v37_v19 }
  0x1d   :  { %v39_v21 = vsel %vm38_vm5, %v36_v18, %v37_v19 }
  0x1e   :  { %v40_v22 = vrot.slane %v39_v21, 1 }
  0x20   :  { %vm41_vm6 = vcmp.lt.s32.totalorder %v39_v21, %v40_v22 }
  0x21   :  { %v42_v24 = vsel %vm41_vm6, %v39_v21, %v40_v22 }
  0x22   :  { %vm49_vm8 = vcmp.eq.s32.totalorder %v42_v24, %v14_v23 }
  0x23   :  { %vm50_vm10 = vmand %vm48_vm7, %vm49_vm8 }
  0x24   :  { %v51_v26 = vsel %vm50_vm10, 1, %v123_v25 }
  0x25   :  { %v53_v27 = vsel %vm52_vm9, %v51_v26, 0 }
  0x26   :  { %v55_v28 = vshrl.u32 %v53_v27, 16  ;;  %v54_v30 = vand.u32 65535, %v53_v27 }
  0x28   :  { %v57_v29 = vcvt.s32.f32 %v55_v28  ;;  %v56_v31 = vcvt.s32.f32 %v54_v30 }
  0x2a   :  { %60 = vadd.xlane.f32.xlu0 %v57_v29 }
  0x32   :  { %58 = vadd.xlane.f32.xlu0 %v56_v31 }
  0x9d   :  { %v61_v32 = vpop.xlane.xlu0 %60 }
  0x9e   :  { %v63_v33 = vcvt.f32.s32 %v61_v32 }
  0xa0   :  { %v64_v35 = vshll.u32 %v63_v33, 16 }
  0xa5   :  { %v59_v34 = vpop.xlane.xlu0 %58 }
  0xa6   :  { %v62_v36 = vcvt.f32.s32 %v59_v34 }
  0xa8   :  { %v65_v37 = vadd.s32 %v64_v35, %v62_v36 }
  0xaa   :  { %v66_v38 = vrot.slane %v65_v37, 4 }
  0xac   :  { %v67_v39 = vadd.s32 %v66_v38, %v65_v37 }
  0xae   :  { %v68_v40 = vrot.slane %v67_v39, 2 }
  0xb0   :  { %v69_v41 = vadd.s32 %v68_v40, %v67_v39 }
  0xb2   :  { %v70_v42 = vrot.slane %v69_v41, 1 }
  0xb4   :  { %v71_v43 = vadd.s32 %v70_v42, %v69_v41 }
  0xb6   :  { %93 = vpush %v71_v43 }
  0xe7   :  { %s94_s18 = spop %93 }
  0xe8   :  { %v74_v44 = vstv %s94_s18 }
  0xe9   :  { %v75_v45 = vsel %vm73_vm11, %v74_v44, 0 }
  0xea   :  { %76 = vst [vmem:[#allocation2] sm:$0x1] %v75_v45 }
  0xeb   :  { %87 = dma.vmem_to_hbm [thread:$0]  %s83_s14, 16, %s85_s17, [#allocation3]  }
  0xec   :  { %121 = dma.done.wait [#allocation3], 16  }
  0xed   :  { %122 = vsyncadd [#allocation3], 4294967280 }
  0xee   :  { %92 = vsyncpa [#allocation3], 1 }

</bundles_post_ra>
